<compile_context>
chip_gen: v7x
topology: tpu7x:2x2x1
jax: 0.10.0
libtpu: 0.0.40
codegen_flags: <defaults>
</compile_context>

<pallas_src>
import numpy as np
import jax
import jax.numpy as jnp
from jax.experimental import pallas as pl
from jax.experimental.pallas import tpu as pltpu


# ------------------------------ fused kernel ---------------------------------

def _make_fused_kernel(Cin, L, Cout, nb, d_lo, d_hi, k_out):
    """Builds the fused CombConvLayer kernel for static shapes / tap counts."""
    S = d_lo + d_hi + 1                      # union of branch tap offsets
    lo_out = (k_out - 1) // 2
    hi_out = k_out - 1 - lo_out
    nbC = nb * Cout

    def _pad_lanes(v, left, right):
        """'same' padding folded in-kernel: zero halo columns along the lane axis."""
        parts = []
        if left > 0:
            parts.append(jnp.zeros((v.shape[0], left), v.dtype))
        parts.append(v)
        if right > 0:
            parts.append(jnp.zeros((v.shape[0], right), v.dtype))
        return parts[0] if len(parts) == 1 else jnp.concatenate(parts, axis=1)

    def kernel(x_ref, wbr_ref, bbr_ref, wox_ref, wob_ref, bout_ref, o_ref):
        # x_ref   : (1, Cin, L)            one batch element, NCL
        # wbr_ref : (S, nb*Cout, Cin)      stacked branch-conv taps (zero-filled
        #                                  where a branch kernel has no tap)
        # bbr_ref : (nb*Cout, 1)           stacked branch biases
        # wox_ref : (k_out, Cout, Cin)     out-conv taps acting on the x rows of the concat
        # wob_ref : (k_out, Cout, nb*Cout) out-conv taps acting on the branch rows
        # bout_ref: (Cout, 1)              out-conv bias
        # o_ref   : (1, Cout, L)           output, NCL
        xv = x_ref[0].astype(jnp.float32)                         # (Cin, L)

        # ---- stage 1: all branch Conv1d + ReLU, per-tap MXU dots, f32 accum ----
        xp1 = _pad_lanes(xv, d_lo, d_hi)                          # (Cin, L + S - 1)
        acc1 = jnp.zeros((nbC, L), jnp.float32)
        for d in range(S):                                        # S small: unrolled
            acc1 = acc1 + jnp.dot(wbr_ref[d], xp1[:, d:d + L],
                                  preferred_element_type=jnp.float32)
        br = jnp.maximum(acc1 + bbr_ref[...], 0.0)                # (nb*Cout, L)

        # ---- stage 2: concat(x, branches) + output Conv1d + ReLU ---------------
        # The concat is never materialized: the out-conv weight is split into its
        # x-part and branch-part, each contracted against its own padded operand.
        # TODO(synk): nn.Dropout on the concat is an inference-time identity here
        # (no RNG mask is applied).
        xp2 = _pad_lanes(xv, lo_out, hi_out)                      # (Cin,     L+k_out-1)
        brp = _pad_lanes(br, lo_out, hi_out)                      # (nb*Cout, L+k_out-1)
        acc2 = jnp.zeros((Cout, L), jnp.float32)
        for t in range(k_out):                                    # k_out small: unrolled
            acc2 = acc2 + jnp.dot(wox_ref[t], xp2[:, t:t + L],
                                  preferred_element_type=jnp.float32)
            acc2 = acc2 + jnp.dot(wob_ref[t], brp[:, t:t + L],
                                  preferred_element_type=jnp.float32)
        out = jnp.maximum(acc2 + bout_ref[...], 0.0)              # (Cout, L)
        o_ref[0] = out.astype(o_ref.dtype)

    return kernel


# ----------------------- weight packing (host side, once) --------------------

def pack_params(params, in_channels, out_channels, kernel_sizes, out_kernel_size):
    """Packs PyTorch-layout (O, I, K) conv weights into per-tap weight pages."""
    nb = len(kernel_sizes)
    Cin, Cout = in_channels, out_channels
    los = [(k - 1) // 2 for k in kernel_sizes]
    d_lo = max(los)
    d_hi = max(k - 1 - lo for k, lo in zip(kernel_sizes, los))
    S = d_lo + d_hi + 1

    wbr = np.zeros((S, nb * Cout, Cin), np.float32)
    bbr = np.zeros((nb * Cout, 1), np.float32)
    for i, ((w_oik, b), k, lo) in enumerate(zip(params["convs"], kernel_sizes, los)):
        w = np.asarray(w_oik)                                     # (Cout, Cin, k)
        for t in range(k):
            d = t - lo + d_lo                                     # tap -> shared shift page
            wbr[d, i * Cout:(i + 1) * Cout, :] = w[:, :, t]
        bbr[i * Cout:(i + 1) * Cout, 0] = np.asarray(b)

    w_out, b_out = params["out"]
    w_out = np.asarray(w_out)                                     # (Cout, Cin + nb*Cout, k_out)
    woutx = np.zeros((out_kernel_size, Cout, Cin), np.float32)
    woutb = np.zeros((out_kernel_size, Cout, nb * Cout), np.float32)
    for t in range(out_kernel_size):
        woutx[t] = w_out[:, :Cin, t]
        woutb[t] = w_out[:, Cin:, t]
    bout = np.asarray(b_out).reshape(Cout, 1).astype(np.float32)

    return {
        "Wbr": jnp.asarray(wbr), "bbr": jnp.asarray(bbr),
        "Woutx": jnp.asarray(woutx), "Woutb": jnp.asarray(woutb),
        "bout": jnp.asarray(bout),
        "d_lo": d_lo, "d_hi": d_hi,
    }


# --------------------------- CombConvLayer forward ---------------------------

def comb_conv_layer(x_ncl, packed, kernel_sizes, out_kernel_size):
    """Fused forward pass matching PyTorch CombConvLayer (inference). NCL in/out."""
    N, Cin, L = x_ncl.shape
    nb = len(kernel_sizes)
    Cout = packed["bout"].shape[0]
    S, nbC = packed["Wbr"].shape[0], packed["Wbr"].shape[1]
    d_lo, d_hi = packed["d_lo"], packed["d_hi"]

    kernel = _make_fused_kernel(Cin, L, Cout, nb, d_lo, d_hi, out_kernel_size)
    return pl.pallas_call(
        kernel,
        out_shape=jax.ShapeDtypeStruct((N, Cout, L), x_ncl.dtype),
        grid=(N,),
        in_specs=[
            pl.BlockSpec((1, Cin, L), lambda n: (n, 0, 0)),                 # x (per-batch row)
            pl.BlockSpec((S, nbC, Cin), lambda n: (0, 0, 0)),               # Wbr   (resident)
            pl.BlockSpec((nbC, 1), lambda n: (0, 0)),                       # bbr   (resident)
            pl.BlockSpec((out_kernel_size, Cout, Cin), lambda n: (0, 0, 0)),# Woutx (resident)
            pl.BlockSpec((out_kernel_size, Cout, nbC), lambda n: (0, 0, 0)),# Woutb (resident)
            pl.BlockSpec((Cout, 1), lambda n: (0, 0)),                      # bout  (resident)
        ],
        out_specs=pl.BlockSpec((1, Cout, L), lambda n: (n, 0, 0)),
        compiler_params=pltpu.CompilerParams(
            dimension_semantics=("parallel",)),                   # 2 TCs on v7x split batch
    )(x_ncl, packed["Wbr"], packed["bbr"], packed["Woutx"], packed["Woutb"],
      packed["bout"])


# ----------------------- deterministic parameter init ------------------------

def init_params(key, in_channels, out_channels, kernel_sizes, out_kernel_size):
    """PyTorch-layout (O, I, K) weights + biases (same init rule as nn.Conv1d)."""
    params = {"convs": []}
    for k in kernel_sizes:
        key, k1, k2 = jax.random.split(key, 3)
        bound = 1.0 / float(np.sqrt(in_channels * k))
        w_oik = jax.random.uniform(k1, (out_channels, in_channels, k),
                                   jnp.float32, -bound, bound)
        b = jax.random.uniform(k2, (out_channels,), jnp.float32, -bound, bound)
        params["convs"].append((w_oik, b))
    cin_total = in_channels + len(kernel_sizes) * out_channels
    key, k1, k2 = jax.random.split(key, 3)
    bound = 1.0 / float(np.sqrt(cin_total * out_kernel_size))
    w_oik = jax.random.uniform(k1, (out_channels, cin_total, out_kernel_size),
                               jnp.float32, -bound, bound)
    b = jax.random.uniform(k2, (out_channels,), jnp.float32, -bound, bound)
    params["out"] = (w_oik, b)
    return params


# ----------------------------- pure-JAX reference ----------------------------

def _ref_conv_relu_ncl(x_ncl, w_oik, b, k):
    pds = k - 1
    lo = pds // 2
    xp = jnp.pad(x_ncl, ((0, 0), (0, 0), (lo, pds - lo)))
    y = jax.lax.conv_general_dilated(xp, w_oik, (1,), "VALID",
                                     dimension_numbers=("NCH", "OIH", "NCH"))
    return jnp.maximum(y + b[None, :, None], 0.0)


def reference(x_ncl, params, kernel_sizes, out_kernel_size):
    outs = [x_ncl]
    for (w_oik, b), k in zip(params["convs"], kernel_sizes):
        outs.append(_ref_conv_relu_ncl(x_ncl, w_oik, b, k))
    cat = jnp.concatenate(outs, axis=1)
    w_oik, b = params["out"]
    return _ref_conv_relu_ncl(cat, w_oik, b, out_kernel_size)


# ------------------------------------ main -----------------------------------

if __name__ == "__main__":
    N, Cin, L = 2, 4, 16
    Cout = 8
    kernel_sizes = (3, 5)
    out_kernel_size = 3

    key = jax.random.PRNGKey(0)
    kx, kp = jax.random.split(key)
    x = jax.random.normal(kx, (N, Cin, L), jnp.float32)   # PyTorch Conv1d layout (N, C, L)
    params = init_params(kp, Cin, Cout, kernel_sizes, out_kernel_size)
    packed = pack_params(params, Cin, Cout, kernel_sizes, out_kernel_size)

    y = comb_conv_layer(x, packed, kernel_sizes, out_kernel_size)
    y = jax.block_until_ready(y)
    assert y.shape == (N, Cout, L)

    y_ref = reference(x, params, kernel_sizes, out_kernel_size)
    np.testing.assert_allclose(np.asarray(y), np.asarray(y_ref), rtol=1e-5, atol=1e-5)

    print("KERNEL_OK")
</pallas_src>

<mosaic_0001>
module attributes {stable_mosaic.version = 11 : i64} {
  func.func @kernel(%arg0: i32, %arg1: memref<1x4x16xf32, #tpu.memory_space<vmem>>, %arg2: memref<5x16x4xf32, #tpu.memory_space<vmem>>, %arg3: memref<16x1xf32, #tpu.memory_space<vmem>>, %arg4: memref<3x8x4xf32, #tpu.memory_space<vmem>>, %arg5: memref<3x8x16xf32, #tpu.memory_space<vmem>>, %arg6: memref<8x1xf32, #tpu.memory_space<vmem>>, %arg7: memref<1x8x16xf32, #tpu.memory_space<vmem>>) attributes {dimension_semantics = [#tpu.dimension_semantics<parallel>], iteration_bounds = array<i64: 2>, scalar_prefetch = 0 : i64, scratch_operands = 0 : i64, tpu.core_type = #tpu.core_type<tc>, window_params = [{transform_indices = @transform_0, window_bounds = array<i64: 1, 4, 16>}, {pipeline_mode = #tpu.pipeline_mode<synchronous>, transform_indices = @transform_1, window_bounds = array<i64: 5, 16, 4>}, {pipeline_mode = #tpu.pipeline_mode<synchronous>, transform_indices = @transform_2, window_bounds = array<i64: 16, 1>}, {pipeline_mode = #tpu.pipeline_mode<synchronous>, transform_indices = @transform_3, window_bounds = array<i64: 3, 8, 4>}, {pipeline_mode = #tpu.pipeline_mode<synchronous>, transform_indices = @transform_4, window_bounds = array<i64: 3, 8, 16>}, {pipeline_mode = #tpu.pipeline_mode<synchronous>, transform_indices = @transform_5, window_bounds = array<i64: 8, 1>}, {transform_indices = @transform_6, window_bounds = array<i64: 1, 8, 16>}]} {
    %c0 = arith.constant 0 : index
    %c0_0 = arith.constant 0 : index
    %c0_1 = arith.constant 0 : index
    %0 = vector.load %arg1[%c0, %c0_0, %c0_1] : memref<1x4x16xf32, #tpu.memory_space<vmem>>, vector<1x4x16xf32>
    %1 = vector.shape_cast %0 : vector<1x4x16xf32> to vector<4x16xf32>
    %cst = arith.constant 0.000000e+00 : f32
    %2 = vector.broadcast %cst : f32 to vector<4x2xf32>
    %cst_2 = arith.constant 0.000000e+00 : f32
    %3 = vector.broadcast %cst_2 : f32 to vector<4x2xf32>
    %4 = tpu.concatenate %2, %1, %3 in 1 : vector<4x2xf32>, vector<4x16xf32>, vector<4x2xf32> -> vector<4x20xf32>
    %cst_3 = arith.constant 0.000000e+00 : f32
    %5 = vector.broadcast %cst_3 : f32 to vector<16x16xf32>
    %c0_4 = arith.constant 0 : index
    %c0_5 = arith.constant 0 : index
    %c0_6 = arith.constant 0 : index
    %6 = vector.load %arg2[%c0_4, %c0_5, %c0_6] : memref<5x16x4xf32, #tpu.memory_space<vmem>>, vector<1x16x4xf32>
    %7 = vector.shape_cast %6 : vector<1x16x4xf32> to vector<16x4xf32>
    %8 = vector.extract_strided_slice %4 {offsets = [0, 0], sizes = [4, 16], strides = [1, 1]} : vector<4x20xf32> to vector<4x16xf32>
    %cst_7 = arith.constant dense<0.000000e+00> : vector<16x16xf32>
    %9 = tpu.matmul %7, %8, %cst_7 {dimension_numbers = #tpu.dot_dimension_numbers<[1], [0], [0], [1], [0, 0, 1, 1], [], []>} : vector<16x4xf32>, vector<4x16xf32>, vector<16x16xf32> -> vector<16x16xf32>
    %10 = arith.addf %5, %9 : vector<16x16xf32>
    %c1 = arith.constant 1 : index
    %c0_8 = arith.constant 0 : index
    %c0_9 = arith.constant 0 : index
    %11 = vector.load %arg2[%c1, %c0_8, %c0_9] : memref<5x16x4xf32, #tpu.memory_space<vmem>>, vector<1x16x4xf32>
    %12 = vector.shape_cast %11 : vector<1x16x4xf32> to vector<16x4xf32>
    %13 = vector.extract_strided_slice %4 {offsets = [0, 1], sizes = [4, 16], strides = [1, 1]} : vector<4x20xf32> to vector<4x16xf32>
    %cst_10 = arith.constant dense<0.000000e+00> : vector<16x16xf32>
    %14 = tpu.matmul %12, %13, %cst_10 {dimension_numbers = #tpu.dot_dimension_numbers<[1], [0], [0], [1], [0, 0, 1, 1], [], []>} : vector<16x4xf32>, vector<4x16xf32>, vector<16x16xf32> -> vector<16x16xf32>
    %15 = arith.addf %10, %14 : vector<16x16xf32>
    %c2 = arith.constant 2 : index
    %c0_11 = arith.constant 0 : index
    %c0_12 = arith.constant 0 : index
    %16 = vector.load %arg2[%c2, %c0_11, %c0_12] : memref<5x16x4xf32, #tpu.memory_space<vmem>>, vector<1x16x4xf32>
    %17 = vector.shape_cast %16 : vector<1x16x4xf32> to vector<16x4xf32>
    %18 = vector.extract_strided_slice %4 {offsets = [0, 2], sizes = [4, 16], strides = [1, 1]} : vector<4x20xf32> to vector<4x16xf32>
    %cst_13 = arith.constant dense<0.000000e+00> : vector<16x16xf32>
    %19 = tpu.matmul %17, %18, %cst_13 {dimension_numbers = #tpu.dot_dimension_numbers<[1], [0], [0], [1], [0, 0, 1, 1], [], []>} : vector<16x4xf32>, vector<4x16xf32>, vector<16x16xf32> -> vector<16x16xf32>
    %20 = arith.addf %15, %19 : vector<16x16xf32>
    %c3 = arith.constant 3 : index
    %c0_14 = arith.constant 0 : index
    %c0_15 = arith.constant 0 : index
    %21 = vector.load %arg2[%c3, %c0_14, %c0_15] : memref<5x16x4xf32, #tpu.memory_space<vmem>>, vector<1x16x4xf32>
    %22 = vector.shape_cast %21 : vector<1x16x4xf32> to vector<16x4xf32>
    %23 = vector.extract_strided_slice %4 {offsets = [0, 3], sizes = [4, 16], strides = [1, 1]} : vector<4x20xf32> to vector<4x16xf32>
    %cst_16 = arith.constant dense<0.000000e+00> : vector<16x16xf32>
    %24 = tpu.matmul %22, %23, %cst_16 {dimension_numbers = #tpu.dot_dimension_numbers<[1], [0], [0], [1], [0, 0, 1, 1], [], []>} : vector<16x4xf32>, vector<4x16xf32>, vector<16x16xf32> -> vector<16x16xf32>
    %25 = arith.addf %20, %24 : vector<16x16xf32>
    %c4 = arith.constant 4 : index
    %c0_17 = arith.constant 0 : index
    %c0_18 = arith.constant 0 : index
    %26 = vector.load %arg2[%c4, %c0_17, %c0_18] : memref<5x16x4xf32, #tpu.memory_space<vmem>>, vector<1x16x4xf32>
    %27 = vector.shape_cast %26 : vector<1x16x4xf32> to vector<16x4xf32>
    %28 = vector.extract_strided_slice %4 {offsets = [0, 4], sizes = [4, 16], strides = [1, 1]} : vector<4x20xf32> to vector<4x16xf32>
    %cst_19 = arith.constant dense<0.000000e+00> : vector<16x16xf32>
    %29 = tpu.matmul %27, %28, %cst_19 {dimension_numbers = #tpu.dot_dimension_numbers<[1], [0], [0], [1], [0, 0, 1, 1], [], []>} : vector<16x4xf32>, vector<4x16xf32>, vector<16x16xf32> -> vector<16x16xf32>
    %30 = arith.addf %25, %29 : vector<16x16xf32>
    %c0_20 = arith.constant 0 : index
    %c0_21 = arith.constant 0 : index
    %31 = vector.load %arg3[%c0_20, %c0_21] : memref<16x1xf32, #tpu.memory_space<vmem>>, vector<16x1xf32>
    %32 = vector.broadcast %31 : vector<16x1xf32> to vector<16x16xf32>
    %33 = arith.addf %30, %32 : vector<16x16xf32>
    %cst_22 = arith.constant 0.000000e+00 : f32
    %34 = vector.broadcast %cst_22 : f32 to vector<16x16xf32>
    %35 = arith.maximumf %33, %34 : vector<16x16xf32>
    %cst_23 = arith.constant 0.000000e+00 : f32
    %36 = vector.broadcast %cst_23 : f32 to vector<4x1xf32>
    %cst_24 = arith.constant 0.000000e+00 : f32
    %37 = vector.broadcast %cst_24 : f32 to vector<4x1xf32>
    %38 = tpu.concatenate %36, %1, %37 in 1 : vector<4x1xf32>, vector<4x16xf32>, vector<4x1xf32> -> vector<4x18xf32>
    %cst_25 = arith.constant 0.000000e+00 : f32
    %39 = vector.broadcast %cst_25 : f32 to vector<16x1xf32>
    %cst_26 = arith.constant 0.000000e+00 : f32
    %40 = vector.broadcast %cst_26 : f32 to vector<16x1xf32>
    %41 = tpu.concatenate %39, %35, %40 in 1 : vector<16x1xf32>, vector<16x16xf32>, vector<16x1xf32> -> vector<16x18xf32>
    %cst_27 = arith.constant 0.000000e+00 : f32
    %42 = vector.broadcast %cst_27 : f32 to vector<8x16xf32>
    %c0_28 = arith.constant 0 : index
    %c0_29 = arith.constant 0 : index
    %c0_30 = arith.constant 0 : index
    %43 = vector.load %arg4[%c0_28, %c0_29, %c0_30] : memref<3x8x4xf32, #tpu.memory_space<vmem>>, vector<1x8x4xf32>
    %44 = vector.shape_cast %43 : vector<1x8x4xf32> to vector<8x4xf32>
    %45 = vector.extract_strided_slice %38 {offsets = [0, 0], sizes = [4, 16], strides = [1, 1]} : vector<4x18xf32> to vector<4x16xf32>
    %cst_31 = arith.constant dense<0.000000e+00> : vector<8x16xf32>
    %46 = tpu.matmul %44, %45, %cst_31 {dimension_numbers = #tpu.dot_dimension_numbers<[1], [0], [0], [1], [0, 0, 1, 1], [], []>} : vector<8x4xf32>, vector<4x16xf32>, vector<8x16xf32> -> vector<8x16xf32>
    %47 = arith.addf %42, %46 : vector<8x16xf32>
    %c0_32 = arith.constant 0 : index
    %c0_33 = arith.constant 0 : index
    %c0_34 = arith.constant 0 : index
    %48 = vector.load %arg5[%c0_32, %c0_33, %c0_34] : memref<3x8x16xf32, #tpu.memory_space<vmem>>, vector<1x8x16xf32>
    %49 = vector.shape_cast %48 : vector<1x8x16xf32> to vector<8x16xf32>
    %50 = vector.extract_strided_slice %41 {offsets = [0, 0], sizes = [16, 16], strides = [1, 1]} : vector<16x18xf32> to vector<16x16xf32>
    %cst_35 = arith.constant dense<0.000000e+00> : vector<8x16xf32>
    %51 = tpu.matmul %49, %50, %cst_35 {dimension_numbers = #tpu.dot_dimension_numbers<[1], [0], [0], [1], [0, 0, 1, 1], [], []>} : vector<8x16xf32>, vector<16x16xf32>, vector<8x16xf32> -> vector<8x16xf32>
    %52 = arith.addf %47, %51 : vector<8x16xf32>
    %c1_36 = arith.constant 1 : index
    %c0_37 = arith.constant 0 : index
    %c0_38 = arith.constant 0 : index
    %53 = vector.load %arg4[%c1_36, %c0_37, %c0_38] : memref<3x8x4xf32, #tpu.memory_space<vmem>>, vector<1x8x4xf32>
    %54 = vector.shape_cast %53 : vector<1x8x4xf32> to vector<8x4xf32>
    %55 = vector.extract_strided_slice %38 {offsets = [0, 1], sizes = [4, 16], strides = [1, 1]} : vector<4x18xf32> to vector<4x16xf32>
    %cst_39 = arith.constant dense<0.000000e+00> : vector<8x16xf32>
    %56 = tpu.matmul %54, %55, %cst_39 {dimension_numbers = #tpu.dot_dimension_numbers<[1], [0], [0], [1], [0, 0, 1, 1], [], []>} : vector<8x4xf32>, vector<4x16xf32>, vector<8x16xf32> -> vector<8x16xf32>
    %57 = arith.addf %52, %56 : vector<8x16xf32>
    %c1_40 = arith.constant 1 : index
    %c0_41 = arith.constant 0 : index
    %c0_42 = arith.constant 0 : index
    %58 = vector.load %arg5[%c1_40, %c0_41, %c0_42] : memref<3x8x16xf32, #tpu.memory_space<vmem>>, vector<1x8x16xf32>
    %59 = vector.shape_cast %58 : vector<1x8x16xf32> to vector<8x16xf32>
    %60 = vector.extract_strided_slice %41 {offsets = [0, 1], sizes = [16, 16], strides = [1, 1]} : vector<16x18xf32> to vector<16x16xf32>
    %cst_43 = arith.constant dense<0.000000e+00> : vector<8x16xf32>
    %61 = tpu.matmul %59, %60, %cst_43 {dimension_numbers = #tpu.dot_dimension_numbers<[1], [0], [0], [1], [0, 0, 1, 1], [], []>} : vector<8x16xf32>, vector<16x16xf32>, vector<8x16xf32> -> vector<8x16xf32>
    %62 = arith.addf %57, %61 : vector<8x16xf32>
    %c2_44 = arith.constant 2 : index
    %c0_45 = arith.constant 0 : index
    %c0_46 = arith.constant 0 : index
    %63 = vector.load %arg4[%c2_44, %c0_45, %c0_46] : memref<3x8x4xf32, #tpu.memory_space<vmem>>, vector<1x8x4xf32>
    %64 = vector.shape_cast %63 : vector<1x8x4xf32> to vector<8x4xf32>
    %65 = vector.extract_strided_slice %38 {offsets = [0, 2], sizes = [4, 16], strides = [1, 1]} : vector<4x18xf32> to vector<4x16xf32>
    %cst_47 = arith.constant dense<0.000000e+00> : vector<8x16xf32>
    %66 = tpu.matmul %64, %65, %cst_47 {dimension_numbers = #tpu.dot_dimension_numbers<[1], [0], [0], [1], [0, 0, 1, 1], [], []>} : vector<8x4xf32>, vector<4x16xf32>, vector<8x16xf32> -> vector<8x16xf32>
    %67 = arith.addf %62, %66 : vector<8x16xf32>
    %c2_48 = arith.constant 2 : index
    %c0_49 = arith.constant 0 : index
    %c0_50 = arith.constant 0 : index
    %68 = vector.load %arg5[%c2_48, %c0_49, %c0_50] : memref<3x8x16xf32, #tpu.memory_space<vmem>>, vector<1x8x16xf32>
    %69 = vector.shape_cast %68 : vector<1x8x16xf32> to vector<8x16xf32>
    %70 = vector.extract_strided_slice %41 {offsets = [0, 2], sizes = [16, 16], strides = [1, 1]} : vector<16x18xf32> to vector<16x16xf32>
    %cst_51 = arith.constant dense<0.000000e+00> : vector<8x16xf32>
    %71 = tpu.matmul %69, %70, %cst_51 {dimension_numbers = #tpu.dot_dimension_numbers<[1], [0], [0], [1], [0, 0, 1, 1], [], []>} : vector<8x16xf32>, vector<16x16xf32>, vector<8x16xf32> -> vector<8x16xf32>
    %72 = arith.addf %67, %71 : vector<8x16xf32>
    %c0_52 = arith.constant 0 : index
    %c0_53 = arith.constant 0 : index
    %73 = vector.load %arg6[%c0_52, %c0_53] : memref<8x1xf32, #tpu.memory_space<vmem>>, vector<8x1xf32>
    %74 = vector.broadcast %73 : vector<8x1xf32> to vector<8x16xf32>
    %75 = arith.addf %72, %74 : vector<8x16xf32>
    %cst_54 = arith.constant 0.000000e+00 : f32
    %76 = vector.broadcast %cst_54 : f32 to vector<8x16xf32>
    %77 = arith.maximumf %75, %76 : vector<8x16xf32>
    %c0_55 = arith.constant 0 : index
    %c0_56 = arith.constant 0 : index
    %c0_57 = arith.constant 0 : index
    %78 = vector.load %arg7[%c0_55, %c0_56, %c0_57] : memref<1x8x16xf32, #tpu.memory_space<vmem>>, vector<1x8x16xf32>
    %79 = vector.shape_cast %78 : vector<1x8x16xf32> to vector<8x16xf32>
    %80 = vector.shape_cast %77 : vector<8x16xf32> to vector<1x8x16xf32>
    tpu.vector_store %arg7[%c0_55, %c0_56, %c0_57], %80 {strides = array<i32>} : memref<1x8x16xf32, #tpu.memory_space<vmem>>, vector<1x8x16xf32>,
    return
  }
  func.func @transform_0(%arg0: i32) -> (i32, i32, i32) {
    %c0_i32 = arith.constant 0 : i32
    %c0_i32_0 = arith.constant 0 : i32
    %c0_i32_1 = arith.constant 0 : i32
    return %arg0, %c0_i32, %c0_i32_0 : i32, i32, i32
  }
  func.func @transform_1(%arg0: i32) -> (i32, i32, i32) {
    %c0_i32 = arith.constant 0 : i32
    %c0_i32_0 = arith.constant 0 : i32
    %c0_i32_1 = arith.constant 0 : i32
    %c0_i32_2 = arith.constant 0 : i32
    return %c0_i32, %c0_i32_0, %c0_i32_1 : i32, i32, i32
  }
  func.func @transform_2(%arg0: i32) -> (i32, i32) {
    %c0_i32 = arith.constant 0 : i32
    %c0_i32_0 = arith.constant 0 : i32
    %c0_i32_1 = arith.constant 0 : i32
    return %c0_i32, %c0_i32_0 : i32, i32
  }
  func.func @transform_3(%arg0: i32) -> (i32, i32, i32) {
    %c0_i32 = arith.constant 0 : i32
    %c0_i32_0 = arith.constant 0 : i32
    %c0_i32_1 = arith.constant 0 : i32
    %c0_i32_2 = arith.constant 0 : i32
    return %c0_i32, %c0_i32_0, %c0_i32_1 : i32, i32, i32
  }
  func.func @transform_4(%arg0: i32) -> (i32, i32, i32) {
    %c0_i32 = arith.constant 0 : i32
    %c0_i32_0 = arith.constant 0 : i32
    %c0_i32_1 = arith.constant 0 : i32
    %c0_i32_2 = arith.constant 0 : i32
    return %c0_i32, %c0_i32_0, %c0_i32_1 : i32, i32, i32
  }
  func.func @transform_5(%arg0: i32) -> (i32, i32) {
    %c0_i32 = arith.constant 0 : i32
    %c0_i32_0 = arith.constant 0 : i32
    %c0_i32_1 = arith.constant 0 : i32
    return %c0_i32, %c0_i32_0 : i32, i32
  }
  func.func @transform_6(%arg0: i32) -> (i32, i32, i32) {
    %c0_i32 = arith.constant 0 : i32
    %c0_i32_0 = arith.constant 0 : i32
    %c0_i32_1 = arith.constant 0 : i32
    return %arg0, %c0_i32, %c0_i32_0 : i32, i32, i32
  }
}

</mosaic_0001>

<bundles_post_ra>
// kernel: tpu_custom_call.1
= control target key start
LH: loop header
LB: loop body
LE: loop exit
PB: predicated region body
PF: predicated region fallthrough
CT: control target
= control target key end

     0   :  { %11 = vsyncpa [#allocation3], 0  ;;  %s1837_s0 = inlined_call_operand.vmem [shape: f32[2,4,16], index: 0, kind: input, shape index: {}]   ;;  %s1838_s1 = inlined_call_operand.vmem [shape: f32[5,16,4], index: 1, kind: input, shape index: {}]   ;;  %s1839_s2 = inlined_call_operand.vmem [shape: f32[16,1], index: 2, kind: input, shape index: {}]   ;;  %s1840_s3 = inlined_call_operand.vmem [shape: f32[3,8,4], index: 3, kind: input, shape index: {}]   ;;  %s1841_s4 = inlined_call_operand.vmem [shape: f32[3,8,16], index: 4, kind: input, shape index: {}]   ;;  %s1842_s5 = inlined_call_operand.vmem [shape: f32[8,1], index: 5, kind: input, shape index: {}]   ;;  %s1843_s6 = inlined_call_operand.hbm [shape: f32[2,8,16], index: 6, kind: output, shape index: {}]  }
   0x1   :  { %13 = vsyncpa [#allocation3 + $0x1], 0  ;;  %s1630_s21 = smov 0   ;;  %s1632_s22 = smov 0  }
   0x2   :  { %s1634_s23 = smov 0   ;;  %s1636_s24 = smov 0  }
   0x3 LB: > { %s1651_s25 = sadd.s32 4294967295, %s1582_s24   ;;  %s1297_s26 = sadd.s32 4294967294, %s1582_s24   ;;  %s1582_s24 = sphi %s1636_s24, %s1849_s24   ;;  %s1578_s23 = sphi %s1634_s23, %s1848_s23   ;;  %s1574_s22 = sphi %s1632_s22, %s1847_s22   ;;  %s1570_s21 = sphi %s1630_s21, %s1846_s21  }
   0x4   : > { %s1655_s27 = sadd.s32 1, %s1582_s24   ;;  %s157_s28 = sadd.s32 1, %s1578_s23 }
   0x5   : > { %s154_s29 = ssub.s32 %s1582_s24, %s1655_s27  ;;  %p167_p0 = scmp.ne.s32.totalorder %s1578_s23, %s1574_s22 }
   0x6   : > { %p155_p1 = scmp.eq.s32.totalorder %s154_s29, 0  ;;  %p168_p2 = scmp.eq.s32.totalorder %s1651_s25, 1 }
   0x7   : > { %p173_p3 = scmp.ne.s32.totalorder %s1574_s22, %s1570_s21  ;;  %p174_p4 = scmp.eq.s32.totalorder %s1297_s26, 1 }
   0x8   : > { %s1666_s30 = scalar_select %p155_p1, %s1578_s23, %s157_s28  }
   0x9   : > { %p1668_p5 = por %p168_p2, %p167_p0  ;;  %p1672_p6 = por %p174_p4, %p173_p3 }
   0xa   : > { %p1300_p7 = scmp.ge.s32.totalorder %s1582_s24, 1  ;;  %p214_p8 = scmp.lt.s32.totalorder %s1582_s24, 3 }
   0xc   : > { %p215_p9 = pnand %p1300_p7, %p214_p8 }
   0xd   : > { %p243_p10 = scmp.lt.s32.totalorder (!%p215_p9), %s1651_s25, 1  ;;  %s1584_s14 = smov (!%p215_p9), 2   ;;  %v1303_v1 = vld [vmem:[%s1838_s1 + $0x10] sm:$0xff] (!%p215_p9)  ;;  %vm264_vm0 = vcmask (!%p215_p9), 31744   ;;  %vm252_vm1 = vcmask (!%p215_p9), 15360   ;;  %vm254_vm2 = vcmask (!%p215_p9), 146432  }
   0xe   : > { %218 = sbr.rel (%p215_p9) target bundleno = 992 (0x3e0), region = 44  ;;  %1377 = vmatprep.mubr.msk.f32.mxu0 (!%p215_p9), %vm264_vm0, %v1303_v1  ;;  %s1585_s17 = smov (!%p215_p9), 126   ;;  %v703_v5 = vld [vmem:[%s1839_s2 + $0x8] sm:$0xff] (!%p215_p9)  ;;  %v702_v6 = vld [vmem:[%s1839_s2] sm:$0xff] (!%p215_p9)  ;;  %v1589_v7 = vmov (!%p215_p9), 0   ;;  %vm271_vm3 = vcmask (!%p215_p9), 1043456  }
   0xf   : > { %s1586_s18 = smov (!%p215_p9), 127   ;;  %s1587_s19 = smov (!%p215_p9), 125   ;;  %1504 = vset.pattern.permute.xlu0 (!%p215_p9), %v1589_v7  ;;  %1503 = vset.pattern.permute.xlu1 (!%p215_p9), %v1589_v7  ;;  %v1304_v9 = vld [vmem:[%s1838_s1 + $0x18] sm:$0xff] (!%p215_p9)  ;;  %v256_v10 = vld [vmem:[%s1838_s1] sm:$0xff] (!%p215_p9)  ;;  %v257_v12 = vld [vmem:[%s1838_s1 + $0x8] sm:$0xff] (!%p215_p9)  ;;  %vm721_vm4 = vcmask (!%p215_p9), 7168  }
  0x10   : > { %s1588_s20 = smov (!%p215_p9), 124   ;;  %v1311_v13 = vld [vmem:[%s1838_s1 + $0x20] sm:$0xff] (!%p215_p9)  ;;  %v1312_v15 = vld [vmem:[%s1838_s1 + $0x28] sm:$0xff] (!%p215_p9)  ;;  %v1316_v16 = vld [vmem:[%s1838_s1 + $0x30] sm:$0xff] (!%p215_p9)  ;;  %s1590_s15 = smov (!%p215_p9), 1   ;;  %vm723_vm5 = vcmask (!%p215_p9), 138240  }
  0x11   : > { %v1317_v18 = vld [vmem:[%s1838_s1 + $0x38] sm:$0xff] (!%p215_p9)  ;;  %v1321_v19 = vld [vmem:[%s1838_s1 + $0x40] sm:$0xff] (!%p215_p9)  ;;  %v1322_v20 = vld [vmem:[%s1838_s1 + $0x48] sm:$0xff] (!%p215_p9)  ;;  %v1591_v26 = vmov (!%p215_p9), 0.0|0.0   ;;  %vm1592_vm6 = vmmov (!%p215_p9), 0   ;;  %v1593_v31 = vmov (!%p215_p9), 0.0  }
  0x12   : > { %1436 = vmatprep.subr.bf16.mxu1 (!%p215_p9), %v1591_v26  ;;  %1404 = vmatprep.mubr.msk.f32.mxu1 (!%p215_p9), %vm1592_vm6, %v1593_v31  ;;  %vm1438_vm7 = vmpackc.low (!%p215_p9), %vm723_vm5, %vm723_vm5  ;;  %v738_v44 = vld [vmem:[%s1841_s4] sm:$0xff] (!%p215_p9)  ;;  %vm739_vm8 = vcmask (!%p215_p9), 130048   ;;  %v1331_v48 = vld [vmem:[%s1840_s3 + $0x8] sm:$0xff] (!%p215_p9) }
  0x13   : > { %v1215_v45 = vld [vmem:[%s1842_s5] sm:$0xff] (!%p215_p9)  ;;  %v1334_v57 = vld [vmem:[%s1841_s4 + $0x8] sm:$0xff] (!%p215_p9)  ;;  %v1339_v58 = vld [vmem:[%s1841_s4 + $0x10] sm:$0xff] (!%p215_p9) }
  0x14   : > { %v737_v46 = vld [vmem:[%s1840_s3] sm:$0xff] (!%p215_p9)  ;;  %v1336_v60 = vld [vmem:[%s1840_s3 + $0x10] sm:$0xff] (!%p215_p9) }
  0x15   : > { %s244_s9 = scalar_select %p243_p10, %s1651_s25, 1 }
  0x17   : > { %s1302_s10 = sshll.u32 %s244_s9, 2 }
  0x18   : > { %s246_s13 = scalar_lea.vmem %s1837_s0, %s1302_s10 }
  0x19   : > { %v247_v0 = vld [vmem:[%s246_s13] sm:$0xf] }
  0x1a   : > { %249 = vrot.lane.b32.xlu0 %v247_v0, %s1584_s14 }
  0x8c   : > { %v250_v2 = vpop.permute.xlu0 %249 }
  0x8d   : > { %v253_v3 = vsel %vm252_vm1, 0.0, %v250_v2 }
  0x8e   : > { %v255_v4 = vsel %vm254_vm2, %v253_v3, 0.0 }
  0x8f   : > { %435 = vrot.lane.b32.xlu1 %v255_v4, %s1585_s17  ;;  %262 = vrot.lane.b32.xlu0 %v255_v4, %s1586_s18 }
  0x93   : > { %525 = vrot.lane.b32.xlu1 %v255_v4, %s1587_s19  ;;  %615 = vrot.lane.b32.xlu0 %v255_v4, %s1588_s20  ;;  %s1342_s19 = sshll.u32 %s1651_s25, 7  ;;  %s1594_s25 = smov [#allocation2]  }
  0x94   : > { %s1524_s10 = sshll.u32 %s1594_s25, 4  ;;  %s1525_s10 = int_to_ptr.vmem [resolvable:$false] %s1524_s10 }
  0x95   : > { %s1526_s11 = scalar_lea.vmem %s1525_s10, 256 }
  0x97   : > { %711 = vperm.xlu0 %1504, %v703_v5   ;;  %706 = vperm.xlu1 %1503, %v702_v6  }
  0x9b   : > { %718 = vrot.lane.b32.xlu1 %v247_v0, %s1590_s15 }
 0x101   : > { %v263_v8 = vpop.permute.xlu0 %262  ;;  %v436_v11 = vpop.permute.xlu1 %435 }
 0x102   : > { %1375 = vmatprep.subr.msk.mxu0 %vm271_vm3, %v263_v8 }
 0x103   : > { %1376 = vmatpush3.msk.msra.mxu0 %vm271_vm3, %v263_v8 }
 0x104   : > { %1378 = vmatmul.mubr.msk.f32.vlgmr.msra.gmra.mrb[0].mxu0 %vm264_vm0, %v1304_v9  ;;  %1380 = vmatprep.subr.msk.mxu0 %vm271_vm3, %v255_v4 }
 0x105   : > { %1381 = vmatpush3.msk.msra.mxu0 %vm271_vm3, %v255_v4  ;;  %1382 = vmatprep.mubr.msk.f32.mxu0 %vm264_vm0, %v256_v10  ;;  %v526_v14 = vpop.permute.xlu1 %525  ;;  %v616_v17 = vpop.permute.xlu0 %615 }
 0x106   : > { %1385 = vmatprep.subr.msk.mxu0 %vm271_vm3, %v436_v11 }
 0x10c   : > { %1383 = vmatmul.mubr.msk.f32.vlgmr.msra.gmra.mrb[0].mxu0 %vm264_vm0, %v257_v12 }
 0x10d   : > { %1386 = vmatpush3.msk.msra.mxu0 %vm271_vm3, %v436_v11  ;;  %1387 = vmatprep.mubr.msk.f32.mxu0 %vm264_vm0, %v1311_v13 }
 0x10e   : > { %1390 = vmatprep.subr.msk.mxu0 %vm271_vm3, %v526_v14 }
 0x114   : > { %1388 = vmatmul.mubr.msk.f32.vlgmr.msra.gmra.mrb[0].mxu0 %vm264_vm0, %v1312_v15 }
 0x115   : > { %1391 = vmatpush3.msk.msra.mxu0 %vm271_vm3, %v526_v14  ;;  %1392 = vmatprep.mubr.msk.f32.mxu0 %vm264_vm0, %v1316_v16 }
 0x116   : > { %1395 = vmatprep.subr.msk.mxu0 %vm271_vm3, %v616_v17  ;;  %v707_v21 = vpop.permute.xlu1 %706  ;;  %v712_v25 = vpop.permute.xlu0 %711 }
 0x11a   : > { %v719_v22 = vpop.permute.xlu1 %718 }
 0x11b   : > { %v722_v23 = vsel %vm721_vm4, 0.0, %v719_v22 }
 0x11c   : > { %1393 = vmatmul.mubr.msk.f32.vlgmr.msra.gmra.mrb[0].mxu0 %vm264_vm0, %v1317_v18  ;;  %v724_v24 = vsel %vm723_vm5, %v722_v23, 0.0 }
 0x11d   : > { %1396 = vmatpush3.msk.msra.mxu0 %vm271_vm3, %v616_v17  ;;  %1397 = vmatprep.mubr.msk.f32.mxu0 %vm264_vm0, %v1321_v19 }
 0x11e   : > { %891 = vrot.lane.b32.xlu0 %v724_v24, %s1586_s18  ;;  %1443 = vmatprep.subr.bf16.mxu0 %v1591_v26 }
 0x124   : > { %1398 = vmatmul.mubr.msk.f32.vlgmr.msra.gmra.mrb[0].mxu0 %vm264_vm0, %v1322_v20 }
 0x125   : > { %1433 = vmatprep.mubr.msk.f32.mxu0 %vm1592_vm6, %v1593_v31 }
 0x190   : > { %v892_v47 = vpop.permute.xlu0 %891 }
 0x1f7   : > { %v1399_v27 = vpop.f32.mrb[0].mxu0 }
 0x1f8   : > { %v715_v28 = vadd.f32 %v1399_v27, %v712_v25  ;;  %v691_v29 = vpop.f32.mrb[1].mxu0 }
 0x1f9   : > { %v714_v30 = vadd.f32 %v707_v21, %v691_v29 }
 0x1fa   : > { %v717_v32 = vmax.f32 %v715_v28, 0.0 }
 0x1fb   : > { %v716_v33 = vmax.f32 %v714_v30, 0.0 }
 0x1fd   : > { %v1505_v34 = vpack.i.bf16 %v717_v32, %v716_v33 }
 0x1ff   : > { %1506 = vrot.lane.b32.xlu1 %v1505_v34, %s1590_s15  ;;  %s240_s15 = sand.u32 1, %s1574_s22  }
 0x200   : > { %s1301_s16 = sshll.u32 %s240_s15, 3  ;;  %s1225_s9 = scalar_lea.sflag [#allocation3], %s240_s15 }
 0x201   : > { %s242_s20 = scalar_lea.vmem [#allocation2], %s1301_s16 }
 0x202   : > { %s1238_s26 = sshll.u32 %s242_s20, 4  ;;  %s1796_s26 = int_to_ptr.vmem [resolvable:$true] %s1238_s26 }
 0x203   : > { %p1527_p0 = scmp.lt.s32.totalorder %s1796_s26, %s1525_s10 }
 0x271   : > { %v1507_v35 = vpop.permute.xlu1 %1506 }
 0x272   : > { %v1509_v36 = vunpack.i.h.bf16 %v1507_v35  ;;  %v1508_v37 = vunpack.i.l.bf16 %v1507_v35 }
 0x274   : > { %v734_v38 = vsel %vm721_vm4, 0.0, %v1509_v36  ;;  %v733_v39 = vsel %vm721_vm4, 0.0, %v1508_v37 }
 0x275   : > { %v736_v40 = vsel %vm723_vm5, %v734_v38, 0.0  ;;  %v735_v41 = vsel %vm723_vm5, %v733_v39, 0.0  ;;  %v1437_v42 = vpack.c.bf16 %v734_v38, %v733_v39 }
 0x276   : > { %v1515_v43 = vpack.i.bf16 %v736_v40, %v735_v41 }
 0x277   : > { %1439 = vmatpush3.bf16.msk.msra.mxu1 %vm1438_vm7, %v1437_v42 }
 0x278   : > { %1516 = vrot.lane.b32.xlu0 %v1515_v43, %s1585_s17  ;;  %1511 = vrot.lane.b32.xlu1 %v1515_v43, %s1586_s18  ;;  %s1794_s18 = scalar_lea.hbm %s1843_s6, %s1342_s19 }
 0x279   : > { %1407 = vmatprep.subr.mxu1 %v1593_v31 }
 0x27a   : > { %1405 = vmatmul.mubr.msk.f32.vlgmr.msra.gmra.mrb[0].mxu1 %vm739_vm8, %v738_v44 }
 0x27b   : > { %1408 = vmatpush3.msk.msra.mxu1 %vm271_vm3, %v724_v24  ;;  %1409 = vmatprep.mubr.msk.f32.mxu1 %vm1592_vm6, %v1593_v31 }
 0x27c   : > { %1218 = vperm.xlu0 %1504, %v1215_v45   ;;  %1055 = vrot.lane.b32.xlu1 %v724_v24, %s1585_s17  ;;  %s1520_s17 = scalar_lea.vmem %s1796_s26, 128 }
 0x27d   : > { %1412 = vmatprep.subr.mxu1 %v1593_v31  ;;  %p1521_p11 = scmp.ne.s32.totalorder %s1796_s26, %s1520_s17  ;;  %p1528_p1 = scmp.lt.s32.totalorder %s1526_s11, %s1520_s17 }
 0x27e   : > { %1410 = vmatmul.mubr.msk.f32.vlgmr.msra.gmra.mrb[2].mxu1 %vm264_vm0, %v737_v46 }
 0x27f   : > { %1413 = vmatpush3.msk.msra.mxu1 %vm271_vm3, %v892_v47  ;;  %1414 = vmatprep.mubr.msk.f32.mxu1 %vm1592_vm6, %v1593_v31  ;;  %p1522_p12 = pnand %p1521_p11, %p1668_p5  ;;  %p1529_p2 = por %p1528_p1, %p1527_p0 }
 0x280   : > { %1440 = vmatprep.subr.bf16.mxu1 %v1591_v26 }
 0x281   : > { %p1523_p13 = pneg %p1522_p12 }
 0x282   : > { %1415 = vmatmul.mubr.msk.f32.vlgmr.msra.gmra.mrb[4].mxu1 %vm264_vm0, %v1331_v48 }
 0x283   : > { %1421 = vmatprep.mubr.msk.f32.mxu1 %vm1592_vm6, %v1593_v31  ;;  %p1530_p3 = pnand %p1529_p2, %p1523_p13 }
 0x2ea   : > { %v1512_v49 = vpop.permute.xlu1 %1511  ;;  %v1517_v50 = vpop.permute.xlu0 %1516 }
 0x2eb   : > { %v1514_v51 = vunpack.i.h.bf16 %v1512_v49  ;;  %v1513_v52 = vunpack.i.l.bf16 %v1512_v49  ;;  %v1519_v53 = vunpack.i.h.bf16 %v1517_v50  ;;  %v1518_v54 = vunpack.i.l.bf16 %v1517_v50 }
 0x2ed   : > { %v1441_v55 = vpack.c.bf16 %v1514_v51, %v1513_v52  ;;  %v1444_v56 = vpack.c.bf16 %v1519_v53, %v1518_v54 }
 0x2ee   : > { %v1056_v59 = vpop.permute.xlu1 %1055 }
 0x2ef   : > { %1442 = vmatpush3.bf16.msra.mxu1 %v1441_v55  ;;  %1445 = vmatpush3.bf16.msra.mxu0 %v1444_v56 }
 0x2f0   : > { %1424 = vmatprep.subr.mxu1 %v1593_v31 }
 0x2f2   : > { %1422 = vmatmul.mubr.msk.f32.vlgmr.msra.gmra.mrb[6].mxu1 %vm739_vm8, %v1334_v57  ;;  %1434 = vmatmul.mubr.msk.f32.vlgmr.msra.gmra.mrb[2].mxu0 %vm739_vm8, %v1339_v58 }
 0x2f3   : > { %1425 = vmatpush3.msk.msra.mxu1 %vm271_vm3, %v1056_v59  ;;  %1426 = vmatprep.mubr.msk.f32.mxu1 %vm1592_vm6, %v1593_v31 }
 0x2f6   : > { %1427 = vmatmul.mubr.msk.f32.vlgmr.msra.gmra.mrb[8].mxu1 %vm264_vm0, %v1336_v60 }
 0x2fb   : > { %v1219_v14 = vpop.permute.xlu0 %1218 }
 0x34d   : > { %v809_v61 = vpop.f32.mrb[0].mxu1 }
 0x34e   : > { %v1406_v62 = vpop.f32.mrb[1].mxu1 }
 0x351   : > { %v885_v63 = vpop.f32.mrb[2].mxu1 }
 0x352   : > { %v886_v0 = vadd.f32 %v885_v63, %v809_v61  ;;  %v1411_v1 = vpop.f32.mrb[3].mxu1 }
 0x355   : > { %v964_v2 = vpop.f32.mrb[4].mxu1 }
 0x356   : > { %v968_v3 = vadd.f32 %v964_v2, %v886_v0  ;;  %v1416_v4 = vpop.f32.mrb[5].mxu1 }
 0x3c5   : > { %v1048_v5 = vpop.f32.mrb[6].mxu1  ;;  %v1210_v6 = vpop.f32.mrb[2].mxu0 }
 0x3c6   : > { %v1052_v7 = vadd.f32 %v1048_v5, %v968_v3  ;;  %v1423_v8 = vpop.f32.mrb[7].mxu1  ;;  %v1435_v9 = vpop.f32.mrb[3].mxu0 }
 0x3c9   : > { %v1128_v10 = vpop.f32.mrb[8].mxu1 }
 0x3ca   : > { %v1132_v11 = vadd.f32 %v1128_v10, %v1052_v7  ;;  %v1428_v12 = vpop.f32.mrb[9].mxu1 }
 0x3cc   : > { %v1214_v13 = vadd.f32 %v1210_v6, %v1132_v11 }
 0x3ce   : > { %v1221_v15 = vadd.f32 %v1219_v14, %v1214_v13 }
 0x3d0   : > { %v1222_v16 = vmax.f32 %v1221_v15, 0.0 }
 0x3d2   : > { %1223 = vst.msk [vmem:[%s242_s20] sm:$0xff] %vm739_vm8, %v1222_v16 }
 0x3d3   : > { %1533 = shalt.err (!%p1530_p3)
}
 0x3d4   : > { %s1534_s12 = scalar_lea.hbm %s1794_s18, 128  ;;  %s1538_s15 = scalar_lea.hbm %s1843_s6, 256 }
 0x3d5   : > { %p1535_p4 = scmp.ne.s32.totalorder %s1794_s18, %s1534_s12  ;;  %p1539_p9 = scmp.lt.u32.totalorder %s1794_s18, %s1843_s6 }
 0x3d6   : > { %p1540_p10 = scmp.lt.u32.totalorder %s1538_s15, %s1534_s12  ;;  %p1542_p12 = scmp.lt.u32.totalorder %s1534_s12, %s1794_s18 }
 0x3d7   : > { %p1536_p7 = pnand %p1535_p4, %p1668_p5 }
 0x3d8   : > { %p1541_p11 = por %p1540_p10, %p1539_p9 }
 0x3d9   : > { %p1537_p8 = pneg %p1536_p7 }
 0x3da   : > { %p1543_p13 = por %p1542_p12, %p1541_p11 }
 0x3dc   : > { %p1544_p0 = pnand %p1543_p13, %p1537_p8 }
 0x3de   : > { %1547 = shalt.err (!%p1544_p0)
}
 0x3df   : > { %1454 = dma.vmem_to_hbm [thread:$0]  (%p1668_p5), %s1796_s26, 128, %s1794_s18, %s1225_s9  }
 0x3e0 PF: > { %p1460_p1 = scmp.ge.s32.totalorder %s1582_s24, 2  ;;  %s1250_s20 = sand.u32 1, %s1570_s21  }
 0x3e1   : > { %s1251_s28 = scalar_lea.sflag [#allocation3], %s1250_s20 }
 0x3e2   : > { %p1457_p2 = pnand %p1460_p1, %p1672_p6 }
 0x3e4   : > { %1565 = dma.done.wait (!%p1457_p2), %s1251_s28, 128  }
 0x3e5   : > { %1567 = vsyncadd (!%p1457_p2), %s1251_s28, 4294967168  ;;  %p16_p3 = scmp.ge.s32.totalorder %s1655_s27, 4   ;;  %s1846_s21 = smov %s1574_s22 }
 0x3e6   : > { %s1847_s22 = smov %s1578_s23  ;;  %s1848_s23 = smov %s1666_s30 }
 0x3e7   : > { %s1849_s24 = smov %s1655_s27  ;;  %18 = sbr.rel (!%p16_p3) target bundleno = 3 (0x3), region = 87 }
 0x3ee   :  { %1256 = vsyncpa [#allocation3], 1 }
 0x3ef   :  { %1258 = vsyncpa [#allocation3 + $0x1], 1 }

</bundles_post_ra>
